<compile_context>
chip_gen: v5e
topology: v5e:2x2
jax: 0.10.0
libtpu: 0.0.40
codegen_flags: <defaults>
</compile_context>

<pallas_src>
import functools

import jax
import jax.numpy as jnp
from jax.experimental import pallas as pl
from jax.experimental.pallas import tpu as pltpu

_DEFAULT_FY = 589.3664541825391 * 0.5
_DEFAULT_FX = 589.3664541825391 * 0.5
_DEFAULT_CY = 240.5 * 0.5
_DEFAULT_CX = 320.5 * 0.5

_LANES = 128
# 512K pixels/step -> ~8 MiB VMEM working set (4 B depth + 12 B xyz per pixel),
# ~16 MiB double-buffered.
_TARGET_PIXELS_PER_STEP = 512 * 1024
_VMEM_LIMIT_BYTES = 48 << 20          # safe on v5e/v6e (128 MiB) and v7x (64 MiB)
# Fallback (N % 128 != 0) path: elements of the flat spatial axis per step.
_FALLBACK_TILE = 128 * 1024


# ----------------------------------------------------------------------------
# Dense path: depth (B, R, 128), output (B, 3, R, 128), R = H*W // 128.
# ----------------------------------------------------------------------------
def _dense_kernel(d_ref, o_ref, *, width, fy, fx, cy, cx):
    # d_ref: (tb, tr, 128) depth rows; o_ref: (tb, 3, tr, 128) xyz rows.
    t = pl.program_id(1)
    rows, lanes = d_ref.shape[-2], d_ref.shape[-1]

    # Flat pixel index of every element of this spatial tile.
    r_iota = jax.lax.broadcasted_iota(jnp.int32, (rows, lanes), 0)
    l_iota = jax.lax.broadcasted_iota(jnp.int32, (rows, lanes), 1)
    flat_f = ((t * rows + r_iota) * lanes + l_iota).astype(jnp.float32)

    # row = flat // W, col = flat % W (exact in f32: wrapper asserts H*W < 2**24).
    w = jnp.float32(width)
    row = jnp.floor(flat_f / w)
    col = flat_f - row * w

    xg = (col - jnp.float32(cx)) / jnp.float32(fx)      # (tr, 128)
    yg = (row - jnp.float32(cy)) / jnp.float32(fy)      # (tr, 128)

    d = d_ref[...]                                      # (tb, tr, 128)
    df = d.astype(jnp.float32)

    # NOTE: the ragged final spatial tile computes on padded/garbage lanes;
    # Pallas masks the out-of-range rows on writeback, so this is benign.
    o_ref[:, 0:1, :, :] = (df * xg).astype(o_ref.dtype)[:, None, :, :]
    o_ref[:, 1:2, :, :] = (df * yg).astype(o_ref.dtype)[:, None, :, :]
    o_ref[:, 2:3, :, :] = d[:, None, :, :]


def _dense_call(depth_nchw, fy, fx, cy, cx):
    B, _, H, W = depth_nchw.shape
    N = H * W
    R = N // _LANES
    dtype = depth_nchw.dtype

    depth_rows = depth_nchw.reshape(B, R, _LANES)            # free reshape

    target_rows = _TARGET_PIXELS_PER_STEP // _LANES          # 4096 (multiple of 8)
    if R >= target_rows:
        tr, tb = target_rows, 1
    else:
        tr = R                                               # full spatial extent
        tb = min(B, max(1, pl.cdiv(target_rows, R)))         # pack small images

    # v7x has two TensorCores: guarantee >= 2 grid steps whenever possible.
    if pl.cdiv(B, tb) * pl.cdiv(R, tr) < 2:
        if B >= 2:
            tb = pl.cdiv(B, 2)
        elif R >= 16:
            tr = ((pl.cdiv(R, 2) + 7) // 8) * 8              # keep tr a multiple of 8

    grid = (pl.cdiv(B, tb), pl.cdiv(R, tr))
    kernel = functools.partial(
        _dense_kernel,
        width=W, fy=float(fy), fx=float(fx), cy=float(cy), cx=float(cx))

    out = pl.pallas_call(
        kernel,
        out_shape=jax.ShapeDtypeStruct((B, 3, R, _LANES), dtype),
        grid_spec=pltpu.PrefetchScalarGridSpec(
            num_scalar_prefetch=0,
            grid=grid,
            in_specs=[pl.BlockSpec((tb, tr, _LANES), lambda b, t: (b, t, 0))],
            out_specs=pl.BlockSpec((tb, 3, tr, _LANES), lambda b, t: (b, 0, t, 0)),
        ),
        compiler_params=pltpu.CompilerParams(
            dimension_semantics=("parallel", "parallel"),
            vmem_limit_bytes=_VMEM_LIMIT_BYTES),
    )(depth_rows)

    return out.reshape(B, 3, H, W)                           # free reshape back


# ----------------------------------------------------------------------------
# Fallback path (H*W not a multiple of 128): flat (B, 1, N)/(B, 3, N) blocks.
# ----------------------------------------------------------------------------
def _flat_kernel(d_ref, o_ref, *, width, fy, fx, cy, cx):
    tile = d_ref.shape[-1]
    t = pl.program_id(1)

    flat = jax.lax.broadcasted_iota(jnp.int32, (1, 1, tile), 2) + t * tile
    flat_f = flat.astype(jnp.float32)
    w = jnp.float32(width)
    row = jnp.floor(flat_f / w)
    col = flat_f - row * w

    xg = (col - jnp.float32(cx)) / jnp.float32(fx)
    yg = (row - jnp.float32(cy)) / jnp.float32(fy)

    d = d_ref[...]
    df = d.astype(jnp.float32)

    o_ref[:, 0:1, :] = (df * xg).astype(o_ref.dtype)
    o_ref[:, 1:2, :] = (df * yg).astype(o_ref.dtype)
    o_ref[:, 2:3, :] = d


def _flat_call(depth_nchw, fy, fx, cy, cx):
    B, _, H, W = depth_nchw.shape
    N = H * W
    dtype = depth_nchw.dtype
    depth_flat = depth_nchw.reshape(B, 1, N)

    if N <= _FALLBACK_TILE:
        tile = N
        tb = min(B, max(1, _FALLBACK_TILE // N))
    else:
        tile = _FALLBACK_TILE
        tb = 1

    kernel = functools.partial(
        _flat_kernel,
        width=W, fy=float(fy), fx=float(fx), cy=float(cy), cx=float(cx))

    out_flat = pl.pallas_call(
        kernel,
        out_shape=jax.ShapeDtypeStruct((B, 3, N), dtype),
        grid_spec=pltpu.PrefetchScalarGridSpec(
            num_scalar_prefetch=0,
            grid=(pl.cdiv(B, tb), pl.cdiv(N, tile)),
            in_specs=[pl.BlockSpec((tb, 1, tile), lambda b, t: (b, 0, t))],
            out_specs=pl.BlockSpec((tb, 3, tile), lambda b, t: (b, 0, t)),
        ),
        compiler_params=pltpu.CompilerParams(
            dimension_semantics=("parallel", "parallel"),
            vmem_limit_bytes=_VMEM_LIMIT_BYTES),
    )(depth_flat)

    return out_flat.reshape(B, 3, H, W)


# ----------------------------------------------------------------------------
# Public entry point (forward of the PyTorch module).
# ----------------------------------------------------------------------------
def depth_image_to_dense_3d_points(
    depth_nchw,
    fy=_DEFAULT_FY,
    fx=_DEFAULT_FX,
    cy=_DEFAULT_CY,
    cx=_DEFAULT_CX,
):
    """depth_nchw: (B, 1, H, W) -> (B, 3, H, W)."""
    B, C, H, W = depth_nchw.shape
    assert C == 1, "depth must have a single channel"
    # f32 row/col recovery is exact only while H*W < 2**24 (covers <= 4K images);
    # fail loudly for larger images rather than silently mis-indexing rows.
    assert H * W < 2 ** 24, "image too large for f32 row/col recovery"

    if (H * W) % _LANES == 0:
        return _dense_call(depth_nchw, fy, fx, cy, cx)
    return _flat_call(depth_nchw, fy, fx, cy, cx)


# ----------------------------------------------------------------------------
# Reference & tests
# ----------------------------------------------------------------------------
def _reference(depth_nchw, fy, fx, cy, cx):
    B, _, H, W = depth_nchw.shape
    d = depth_nchw[:, 0].astype(jnp.float32)                       # (B, H, W)
    xg = (jnp.arange(W, dtype=jnp.float32) - cx) / fx              # (W,)
    yg = (jnp.arange(H, dtype=jnp.float32) - cy) / fy              # (H,)
    x = d * xg[None, None, :]
    y = d * yg[None, :, None]
    return jnp.stack([x, y, d], axis=1).astype(depth_nchw.dtype)   # (B, 3, H, W)


def _check(B, H, W, key, fy, fx, cy, cx):
    depth = jax.random.uniform(key, (B, 1, H, W), dtype=jnp.float32) * 5.0
    out = jax.block_until_ready(
        depth_image_to_dense_3d_points(depth, fy, fx, cy, cx))
    ref = _reference(depth, fy, fx, cy, cx)
    assert out.shape == (B, 3, H, W)
    assert jnp.allclose(out, ref, atol=1e-5, rtol=1e-5), (B, H, W)


if __name__ == "__main__":
    key = jax.random.PRNGKey(0)
    k0, k1, k2, k3 = jax.random.split(key, 4)
    fy, fx, cy, cx = _DEFAULT_FY, _DEFAULT_FX, _DEFAULT_CY, _DEFAULT_CX

    # Small image: dense path, batch split into >= 2 grid steps.
    _check(2, 16, 16, k0, fy, fx, cy, cx)
    # Realistic image size (non-power-of-two width): dense path, batch blocks.
    _check(2, 240, 320, k1, fy, fx, cy, cx)
    # Larger single image: dense path, spatial axis split for 2 TensorCores.
    _check(1, 480, 640, k2, fy, fx, cy, cx)
    # H*W not a multiple of 128: exercises the flat fallback path.
    _check(2, 17, 23, k3, fy, fx, cy, cx)

    print("KERNEL_OK")
</pallas_src>

<mosaic_0001>
module attributes {stable_mosaic.version = 11 : i64} {
  func.func @_dense_kernel(%arg0: i32, %arg1: i32, %arg2: memref<1x2x128xf32, #tpu.memory_space<vmem>>, %arg3: memref<1x3x2x128xf32, #tpu.memory_space<vmem>>) attributes {dimension_semantics = [#tpu.dimension_semantics<parallel>, #tpu.dimension_semantics<parallel>], iteration_bounds = array<i64: 2, 1>, scalar_prefetch = 0 : i64, scratch_operands = 0 : i64, tpu.core_type = #tpu.core_type<tc>, window_params = [{transform_indices = @transform_0, window_bounds = array<i64: 1, 2, 128>}, {transform_indices = @transform_1, window_bounds = array<i64: 1, 3, 2, 128>}]} {
    %0 = tpu.iota {dimensions = array<i32: 0>} : vector<2x128xi32>
    %1 = tpu.iota {dimensions = array<i32: 1>} : vector<2x128xi32>
    %c2_i32 = arith.constant 2 : i32
    %2 = arith.muli %arg1, %c2_i32 : i32
    %3 = vector.broadcast %2 : i32 to vector<2x128xi32>
    %4 = arith.addi %3, %0 : vector<2x128xi32>
    %c128_i32 = arith.constant 128 : i32
    %5 = vector.broadcast %c128_i32 : i32 to vector<2x128xi32>
    %6 = arith.muli %4, %5 : vector<2x128xi32>
    %7 = arith.addi %6, %1 : vector<2x128xi32>
    %8 = arith.sitofp %7 : vector<2x128xi32> to vector<2x128xf32>
    %cst = arith.constant 1.600000e+01 : f32
    %9 = vector.broadcast %cst : f32 to vector<2x128xf32>
    %10 = arith.divf %8, %9 : vector<2x128xf32>
    %11 = math.floor %10 : vector<2x128xf32>
    %cst_0 = arith.constant 1.600000e+01 : f32
    %12 = vector.broadcast %cst_0 : f32 to vector<2x128xf32>
    %13 = arith.mulf %11, %12 : vector<2x128xf32>
    %14 = arith.subf %8, %13 : vector<2x128xf32>
    %cst_1 = arith.constant 1.602500e+02 : f32
    %15 = vector.broadcast %cst_1 : f32 to vector<2x128xf32>
    %16 = arith.subf %14, %15 : vector<2x128xf32>
    %cst_2 = arith.constant 294.683228 : f32
    %17 = vector.broadcast %cst_2 : f32 to vector<2x128xf32>
    %18 = arith.divf %16, %17 : vector<2x128xf32>
    %cst_3 = arith.constant 1.202500e+02 : f32
    %19 = vector.broadcast %cst_3 : f32 to vector<2x128xf32>
    %20 = arith.subf %11, %19 : vector<2x128xf32>
    %cst_4 = arith.constant 294.683228 : f32
    %21 = vector.broadcast %cst_4 : f32 to vector<2x128xf32>
    %22 = arith.divf %20, %21 : vector<2x128xf32>
    %c0 = arith.constant 0 : index
    %c0_5 = arith.constant 0 : index
    %c0_6 = arith.constant 0 : index
    %23 = vector.load %arg2[%c0, %c0_5, %c0_6] : memref<1x2x128xf32, #tpu.memory_space<vmem>>, vector<1x2x128xf32>
    %24 = vector.shape_cast %18 : vector<2x128xf32> to vector<1x2x128xf32>
    %25 = arith.mulf %23, %24 : vector<1x2x128xf32>
    %26 = vector.shape_cast %25 : vector<1x2x128xf32> to vector<1x1x2x128xf32>
    %c0_7 = arith.constant 0 : index
    %c0_8 = arith.constant 0 : index
    %c0_9 = arith.constant 0 : index
    %c0_10 = arith.constant 0 : index
    %27 = vector.load %arg3[%c0_7, %c0_8, %c0_9, %c0_10] : memref<1x3x2x128xf32, #tpu.memory_space<vmem>>, vector<1x1x2x128xf32>
    tpu.vector_store %arg3[%c0_7, %c0_8, %c0_9, %c0_10], %26 {strides = array<i32>} : memref<1x3x2x128xf32, #tpu.memory_space<vmem>>, vector<1x1x2x128xf32>,
    %28 = vector.shape_cast %22 : vector<2x128xf32> to vector<1x2x128xf32>
    %29 = arith.mulf %23, %28 : vector<1x2x128xf32>
    %30 = vector.shape_cast %29 : vector<1x2x128xf32> to vector<1x1x2x128xf32>
    %c0_11 = arith.constant 0 : index
    %c1 = arith.constant 1 : index
    %c0_12 = arith.constant 0 : index
    %c0_13 = arith.constant 0 : index
    %31 = vector.load %arg3[%c0_11, %c1, %c0_12, %c0_13] : memref<1x3x2x128xf32, #tpu.memory_space<vmem>>, vector<1x1x2x128xf32>
    tpu.vector_store %arg3[%c0_11, %c1, %c0_12, %c0_13], %30 {strides = array<i32>} : memref<1x3x2x128xf32, #tpu.memory_space<vmem>>, vector<1x1x2x128xf32>,
    %32 = vector.shape_cast %23 : vector<1x2x128xf32> to vector<1x1x2x128xf32>
    %c0_14 = arith.constant 0 : index
    %c2 = arith.constant 2 : index
    %c0_15 = arith.constant 0 : index
    %c0_16 = arith.constant 0 : index
    %33 = vector.load %arg3[%c0_14, %c2, %c0_15, %c0_16] : memref<1x3x2x128xf32, #tpu.memory_space<vmem>>, vector<1x1x2x128xf32>
    tpu.vector_store %arg3[%c0_14, %c2, %c0_15, %c0_16], %32 {strides = array<i32>} : memref<1x3x2x128xf32, #tpu.memory_space<vmem>>, vector<1x1x2x128xf32>,
    return
  }
  func.func @transform_0(%arg0: i32, %arg1: i32) -> (i32, i32, i32) {
    %c0_i32 = arith.constant 0 : i32
    %c0_i32_0 = arith.constant 0 : i32
    return %arg0, %arg1, %c0_i32 : i32, i32, i32
  }
  func.func @transform_1(%arg0: i32, %arg1: i32) -> (i32, i32, i32, i32) {
    %c0_i32 = arith.constant 0 : i32
    %c0_i32_0 = arith.constant 0 : i32
    %c0_i32_1 = arith.constant 0 : i32
    return %arg0, %c0_i32, %arg1, %c0_i32_0 : i32, i32, i32, i32
  }
}

</mosaic_0001>

<bundles_post_ra>
// kernel: tpu_custom_call.1
= control target key start
LH: loop header
LB: loop body
LE: loop exit
PB: predicated region body
PF: predicated region fallthrough
CT: control target
= control target key end

     0   :  { %6 = vsyncpa [#allocation3], 0  ;;  %s634_s0 = inlined_call_operand.hbm [shape: f32[2,2,128], index: 0, kind: input, shape index: {}]   ;;  %s635_s1 = inlined_call_operand.hbm [shape: f32[2,3,2,128], index: 1, kind: output, shape index: {}]  }
   0x1   :  { %8 = vsyncpa [#allocation3 + $0x1], 0 }
   0x2   :  { %9 = vsyncpa [#allocation4], 0 }
   0x3   :  { %11 = vsyncpa [#allocation4 + $0x1], 0  ;;  %s507_s6 = smov 0   ;;  %s509_s7 = smov 0  }
   0x4   :  { %s511_s8 = smov 0   ;;  %s513_s9 = smov 0  }
   0x5   :  { %s515_s10 = smov 0   ;;  %s517_s11 = smov 0  }
   0x6 LB: > { %s292_s12 = sadd.s32 4294967295, %s491_s11   ;;  %s293_s13 = sadd.s32 4294967294, %s491_s11   ;;  %s491_s11 = sphi %s517_s11, %s17_s11   ;;  %s487_s10 = sphi %s515_s10, %s644_s10   ;;  %s483_s9 = sphi %s513_s9, %s643_s9   ;;  %s479_s8 = sphi %s511_s8, %s642_s8   ;;  %s475_s7 = sphi %s509_s7, %s641_s7   ;;  %s471_s6 = sphi %s507_s6, %s640_s6  }
   0x7   : > { %s29_s14 = sadd.s32 1, %s487_s10  ;;  %s38_s15 = sadd.s32 1, %s479_s8 }
   0x8   : > { %p31_p0 = scmp.ge.s32.totalorder %s29_s14, 2  ;;  %p45_p1 = scmp.ne.s32.totalorder %s479_s8, %s475_s7 }
   0x9   : > { %p46_p2 = scmp.eq.s32.totalorder %s491_s11, 0  ;;  %p51_p3 = scmp.ne.s32.totalorder %s475_s7, %s471_s6 }
   0xa   : > { %s646_s14 = smov (%p31_p0, %s29_s14), 0  ;;  %p52_p5 = scmp.eq.s32.totalorder %s292_s12, 0 }
   0xb   : > { %p548_p4 = por %p46_p2, %p45_p1  ;;  %s33_s17 = ssub.s32 %s487_s10, %s646_s14 }
   0xc   : > { %p77_p6 = scmp.eq.s32.totalorder %s292_s12, 1  ;;  %p36_p7 = scmp.eq.s32.totalorder %s33_s17, 0 }
   0xd   : > { %p554_p8 = por %p52_p5, %p51_p3  ;;  %p83_p10 = scmp.eq.s32.totalorder %s293_s13, 1 }
   0xe   : > { %p558_p9 = por %p77_p6, %p45_p1  ;;  %p295_p12 = scmp.ge.s32.totalorder %s491_s11, 2 }
   0xf   : > { %s563_s20 = scalar_select %p36_p7, %s479_s8, %s38_s15  }
  0x10   : > { %p565_p11 = por %p83_p10, %p51_p3  ;;  %p321_p13 = scmp.lt.s32.totalorder %s491_s11, 2 }
  0x11   : > { %s103_s22 = sand.u32 1, %s479_s8   ;;  %s297_s24 = sshll.u32 %s487_s10, 1 }
  0x12   : > { %s296_s23 = sshll.u32 %s103_s22, 1  ;;  %s112_s27 = scalar_lea.hbm %s634_s0, %s297_s24 }
  0x13   : > { %s107_s28 = scalar_lea.vmem [#allocation2], %s296_s23  ;;  %s114_s30 = sshll.u32 %s112_s27, 4  ;;  %s115_s30 = int_to_ptr.hbm [resolvable:$true] %s114_s30 }
  0x14   : > { %s116_s29 = sshll.u32 %s107_s28, 4  ;;  %p314_p0 = pnand %p321_p13, %p548_p4  ;;  %s117_s29 = int_to_ptr.vmem [resolvable:$true] %s116_s29 }
  0x15   : > { %p298_p1 = scmp.ge.s32.totalorder %s491_s11, 1  ;;  %p121_p2 = scmp.lt.s32.totalorder %s491_s11, 3 }
  0x16   : > { %s104_s2 = scalar_lea.sflag [#allocation3], %s103_s22 }
  0x17   : > { %316 = dma.hbm_to_vmem [thread:$0]  (!%p314_p0), %s115_s30, 32, %s117_s29, %s104_s2  }
  0x18   : > { %p122_p3 = pnand %p298_p1, %p121_p2 }
  0x19   : > { %s581_s3 = sand.u32 (!%p122_p3), 1, %s475_s7  }
  0x1a   : > { %125 = sbr.rel (%p122_p3) target bundleno = 67 (0x43), region = 24  ;;  %s299_s4 = sshll.u32 (!%p122_p3), %s581_s3, 1 }
  0x1b   : > { %s128_s5 = scalar_lea.sflag (!%p122_p3), [#allocation3], %s581_s3  ;;  %s131_s12 = scalar_lea.vmem (!%p122_p3), [#allocation2], %s299_s4 }
  0x1f   : > { %462 = dma.done.wait (%p554_p8), %s128_s5, 32  }
  0x20   : > { %464 = vsyncadd (%p554_p8), %s128_s5, 4294967264  ;;  %v151_v0 = vlaneseq  ;;  %s307_s13 = smul.u32 6, %s581_s3  ;;  %v493_v1 = vmov 16.0   ;;  %v494_v3 = vmov 294.68323   ;;  %s429_s29 = scalar_lea.hbm %s635_s1, 12 }
  0x21   : > { %375 = vrcp.f32 %v493_v1  ;;  %v183_v7 = vld [vmem:[%s131_s12] sm:$0x3]  ;;  %s308_s16 = smul.u32 6, %s483_s9  ;;  %s192_s9 = scalar_lea.sflag [#allocation4], %s581_s3 }
  0x22   : > { %v152_v2 = vshrl.u32 %v151_v0, 7  ;;  %377 = vrcp.f32 %v494_v3  ;;  %v154_v4 = vand.u32 127, %v151_v0  ;;  %s590_s15 = scalar_lea.vmem [#allocation5], %s307_s13 }
  0x23   : > { %303 = vst [vmem:[%s590_s15 + $0x4] sm:$0x3] %v183_v7  ;;  %s204_s22 = scalar_lea.hbm %s635_s1, %s308_s16  ;;  %s205_s23 = sshll.u32 %s590_s15, 4  ;;  %s206_s23 = int_to_ptr.vmem [resolvable:$true] %s205_s23 }
  0x24   : > { %v158_v5 = vmul.u32 128, %v152_v2  ;;  %s207_s24 = sshll.u32 %s204_s22, 4  ;;  %s208_s24 = int_to_ptr.hbm [resolvable:$true] %s207_s24 }
  0x25   : > { %s423_s25 = sshra.s32 %s208_s24, 4  ;;  %s424_s25 = int_to_ptr.hbm [resolvable:$true] %s423_s25 }
  0x26   : > { %v159_v10 = vadd.s32 %v158_v5, %v154_v4  ;;  %s425_s26 = scalar_lea.hbm %s424_s25, 6  ;;  %p430_p7 = scmp.lt.s32.totalorder %s424_s25, %s635_s1 }
  0x27   : > { %v376_v6 = vpop.eup %375  ;;  %p426_p4 = scmp.ne.s32.totalorder %s424_s25, %s425_s26  ;;  %p431_p8 = scmp.lt.s32.totalorder %s429_s29, %s425_s26 }
  0x28   : > { %v378_v8 = vpop.eup %377  ;;  %v162_v9 = vmul.f32 16.0, %v376_v6  ;;  %v160_v15 = vcvt.s32.f32 %v159_v10  ;;  %vm166_vm0 = vweird.f32 %v376_v6 }
  0x29   : > { %v174_v11 = vmul.f32 294.68323, %v378_v8  ;;  %vm178_vm1 = vweird.f32 %v378_v8  ;;  %p427_p5 = pnand %p426_p4, %p558_p9  ;;  %p432_p10 = por %p431_p8, %p430_p7 }
  0x2a   : > { %v163_v12 = vsub.f32 1.0, %v162_v9 }
  0x2b   : > { %v175_v13 = vsub.f32 1.0, %v174_v11  ;;  %p428_p6 = pneg %p427_p5 }
  0x2c   : > { %v164_v14 = vmul.f32 %v376_v6, %v163_v12 }
  0x2d   : > { %v176_v16 = vmul.f32 %v378_v8, %v175_v13  ;;  %p433_p13 = pnand %p432_p10, %p428_p6 }
  0x2e   : > { %v165_v17 = vadd.f32 %v376_v6, %v164_v14 }
  0x2f   : > { %v177_v19 = vadd.f32 %v378_v8, %v176_v16 }
  0x30   : > { %v167_v18 = vsel %vm166_vm0, %v376_v6, %v165_v17 }
  0x31   : > { %v168_v20 = vmul.f32 %v167_v18, %v160_v15  ;;  %v179_v22 = vsel %vm178_vm1, %v378_v8, %v177_v19 }
  0x33   : > { %v169_v21 = vfloor.f32 %v168_v20 }
  0x35   : > { %v170_v23 = vmul.f32 16.0, %v169_v21  ;;  %v301_v24 = vadd.f32 -120.25, %v169_v21 }
  0x37   : > { %v171_v25 = vsub.f32 %v160_v15, %v170_v23  ;;  %v182_v26 = vmul.f32 %v301_v24, %v179_v22 }
  0x39   : > { %v300_v27 = vadd.f32 -160.25, %v171_v25  ;;  %v186_v28 = vmul.f32 %v183_v7, %v182_v26 }
  0x3b   : > { %v180_v29 = vmul.f32 %v300_v27, %v179_v22  ;;  %302 = vst [vmem:[%s590_s15 + $0x2] sm:$0x3] %v186_v28 }
  0x3d   : > { %v184_v30 = vmul.f32 %v183_v7, %v180_v29 }
  0x3f   : > { %185 = vst [vmem:[%s590_s15] sm:$0x3] %v184_v30 }
  0x40   : > { %436 = shalt.err (!%p433_p13)
}
  0x41   : > { %s495_s3 = smov 32   ;;  %s496_s4 = smov 2  }
  0x42   : > { %311 = dma.vmem_to_hbm [thread:$0]  (%p558_p9), %s206_s23, 96, %s208_s24, %s192_s9, %s495_s3, %s495_s3, %s496_s4  }
  0x43 PF: > { %s222_s5 = sand.u32 1, %s471_s6   ;;  %p318_p0 = pnand %p295_p12, %p565_p11 }
  0x44   : > { %s223_s12 = scalar_lea.sflag [#allocation4], %s222_s5 }
  0x45   : > { %p319_p1 = pneg %p318_p0 }
  0x47   : > { %466 = dma.done.wait (%p319_p1), %s223_s12, 96  }
  0x48   : > { %468 = vsyncadd (%p319_p1), %s223_s12, 4294967200  ;;  %s17_s11 = sadd.s32 1, %s491_s11   ;;  %s640_s6 = smov %s475_s7 }
  0x49   : > { %p14_p2 = scmp.ge.s32.totalorder %s17_s11, 4   ;;  %s641_s7 = smov %s479_s8 }
  0x4a   : > { %s642_s8 = smov %s563_s20  ;;  %s643_s9 = smov %s487_s10 }
  0x4b   : > { %s644_s10 = smov %s646_s14  ;;  %16 = sbr.rel (!%p14_p2) target bundleno = 6 (0x6), region = 71 }
  0x50   :  { %229 = vsyncpa [#allocation3], 1 }
  0x51   :  { %231 = vsyncpa [#allocation3 + $0x1], 1 }
  0x52   :  { %232 = vsyncpa [#allocation4], 1 }
  0x53   :  { %234 = vsyncpa [#allocation4 + $0x1], 1 }

</bundles_post_ra>
